<compile_context>
chip_gen: v7x
topology: tpu7x:2x2x1
jax: 0.10.0
libtpu: 0.0.40
codegen_flags: <defaults>
</compile_context>

<pallas_src>
import functools

import numpy as np
import jax
import jax.numpy as jnp
from jax.experimental import pallas as pl
from jax.experimental.pallas import tpu as pltpu

ALPHA = 0.1                      # self.alpha
EPS = 1e-5                       # eps of dis_calculation (self.smooth unused)

_VMEM_BLOCK_BUDGET = 12 * 1024 * 1024   # budget for double-buffered input blocks
_VMEM_LIMIT = 48 * 1024 * 1024          # raise scoped VMEM (v5e default 16 MiB),
                                        # still well under v7x's 64 MiB physical


def _choose_channel_tile(cf, d1, d2, h):
    """Largest channel tile whose double-buffered blocks fit the VMEM budget."""
    per_ch = 2 * 2 * (d1 * d2 * 2)                  # predict+target, bf16, 2 bufs
    fixed = 2 * (d1 * d2 * 4) + 2 * (h * h * 4)     # argmax(int32) + tri(f32), 2 bufs
    avail = max(_VMEM_BLOCK_BUDGET - fixed, per_ch)
    return int(max(1, min(cf, avail // per_ch)))


def _localization_loss_kernel(amax_ref, p_ref, t_ref, tri_ref,
                              abs_ref, l1_ref, *, w_axis, eps):
    """One (batch element, channel tile) block.

    amax_ref: (1, d1, d2)  int32   per-pixel argmax channel (over full C)
    p_ref   : (1, tc, d1, d2) bf16 foreground predict channels
    t_ref   : (1, tc, d1, d2) bf16 foreground one-hot target channels
    tri_ref : (H, H) f32           inclusive upper-triangular (cumsum matrix)
    abs_ref : (1, 1, 1, 1) f32     sum |dist_p - dist_t| over (tc, H)
    l1_ref  : (1, 1, 1, 1) f32     sum |sum_fp + sum_fn| over tc
    The cumsum/H axis is the LAST axis of the block; `w_axis` (1 or 2) is the
    axis that gets summed away (the original W axis).
    """
    _, tc, d1, d2 = p_ref.shape
    j = pl.program_id(1)                       # channel-tile index

    p = p_ref[0].astype(jnp.float32)           # (tc, d1, d2)
    t = t_ref[0].astype(jnp.float32)
    amax = amax_ref[0]                         # (d1, d2) int32

    # Original channel ids covered by this tile: 1 + j*tc + [0, tc).
    base = 1 + j * tc
    ch_ids = jax.lax.broadcasted_iota(jnp.int32, (tc, d1, d2), 0) + base
    is_am = amax[None, :, :] == ch_ids         # argmax(predict, 1) == c

    # fp = predict * ((pred_onehot==1) & (y_onehot==0))
    fp = jnp.where(is_am & (t == 0.0), p, 0.0)
    # fn = y_onehot * ((pred_onehot==0) & (y_onehot==1))  (== indicator)
    fn = jnp.where(jnp.logical_not(is_am) & (t == 1.0),
                   jnp.float32(1.0), jnp.float32(0.0))

    # Per-H marginals (== flatten(3).sum(-1)), H ends up on the lane axis.
    dp = jnp.sum(fp, axis=w_axis)              # (tc, H)
    dt = jnp.sum(fn, axis=w_axis)              # (tc, H)

    # One batched MXU matmul: inclusive cumsum over H for fp AND fn of every
    # channel in the tile. Last column == full sum (sp / st).
    cums = jnp.dot(jnp.concatenate([dp, dt], axis=0), tri_ref[...],
                   preferred_element_type=jnp.float32)      # (2*tc, H)
    cp = cums[:tc]
    ct = cums[tc:]
    sp = cp[:, -1:]                            # (tc, 1) totals
    st = ct[:, -1:]

    dist_p = cp / (sp + eps)
    dist_t = ct / (st + eps)

    abs_ref[...] = jnp.full((1, 1, 1, 1),
                            jnp.sum(jnp.abs(dist_p - dist_t)),
                            dtype=jnp.float32)
    l1_ref[...] = jnp.full((1, 1, 1, 1),
                           jnp.sum(jnp.abs(sp + st)),
                           dtype=jnp.float32)


def localization_loss(predict, target, *, alpha=ALPHA, eps=EPS):
    """predict, target: [N, C, H, W] float (target is a hard one-hot). Scalar loss."""
    N, C, H, W = predict.shape
    assert target.shape == predict.shape, "expects a same-shape one-hot target"
    assert C >= 2, "LocalizationLoss needs at least one foreground channel"
    CF = C - 1

    # Per-pixel argmax channel precomputed in plain XLA (perf-review item:
    # halves predict traffic inside the kernel, decouples channels).
    amax = jnp.argmax(predict, axis=1).astype(jnp.int32)          # [N, H, W]

    # Foreground-only slabs, bf16 in HBM/VMEM (memory-bound kernel).
    p_fg = predict[:, 1:].astype(jnp.bfloat16)                    # [N, CF, H, W]
    t_fg = target[:, 1:].astype(jnp.bfloat16)

    # Lane density: if W (< 128) is the narrow dim, put H on the lane axis and
    # reduce W along sublanes instead.
    transpose_hw = (W < 128) and (H > W)
    if transpose_hw:
        p_fg = jnp.swapaxes(p_fg, -1, -2)                         # [N, CF, W, H]
        t_fg = jnp.swapaxes(t_fg, -1, -2)
        amax = jnp.swapaxes(amax, -1, -2)                         # [N, W, H]
        w_axis = 1
    else:
        w_axis = 2
    d1, d2 = p_fg.shape[-2:]

    # Channel tile from a VMEM budget; pad foreground channels to a multiple.
    # Padded channels are all-zero and never match the argmax map -> they
    # contribute exactly 0 to both partial sums.
    tc = _choose_channel_tile(CF, d1, d2, H)
    n_ct = pl.cdiv(CF, tc)
    cf_pad = n_ct * tc
    if cf_pad != CF:
        pad = ((0, 0), (0, cf_pad - CF), (0, 0), (0, 0))
        p_fg = jnp.pad(p_fg, pad)
        t_fg = jnp.pad(t_fg, pad)

    # Inclusive upper-triangular matrix: (x @ tri)[:, i] = sum_{h<=i} x[:, h].
    # Built once in the wrapper, resident in VMEM via a constant index_map.
    hh = jnp.arange(H, dtype=jnp.int32)
    tri = (hh[:, None] <= hh[None, :]).astype(jnp.float32)        # [H, H]

    kernel = functools.partial(_localization_loss_kernel,
                               w_axis=w_axis, eps=eps)

    grid_spec = pltpu.PrefetchScalarGridSpec(
        num_scalar_prefetch=0,
        grid=(N, n_ct),
        in_specs=[
            pl.BlockSpec((1, d1, d2), lambda n, j: (n, 0, 0)),         # argmax
            pl.BlockSpec((1, tc, d1, d2), lambda n, j: (n, j, 0, 0)),  # predict fg
            pl.BlockSpec((1, tc, d1, d2), lambda n, j: (n, j, 0, 0)),  # target fg
            pl.BlockSpec((H, H), lambda n, j: (0, 0)),                 # tri (resident)
        ],
        out_specs=[
            pl.BlockSpec((1, 1, 1, 1), lambda n, j: (n, j, 0, 0)),     # |dist| partials
            pl.BlockSpec((1, 1, 1, 1), lambda n, j: (n, j, 0, 0)),     # l1 partials
        ],
    )

    abs_part, l1_part = pl.pallas_call(
        kernel,
        out_shape=(jax.ShapeDtypeStruct((N, n_ct, 1, 1), jnp.float32),
                   jax.ShapeDtypeStruct((N, n_ct, 1, 1), jnp.float32)),
        grid_spec=grid_spec,
        compiler_params=pltpu.CompilerParams(
            dimension_semantics=("parallel", "parallel"),
            vmem_limit_bytes=_VMEM_LIMIT),
    )(amax, p_fg, t_fg, tri)

    total_abs = jnp.sum(abs_part)      # sum |dist_p - dist_t| over (N, CF, H)
    total_l1 = jnp.sum(l1_part)        # sum |sum_fp + sum_fn| over (N, CF)

    sqrt_h = jnp.sqrt(jnp.asarray(H, jnp.float32))                 # sqrt(n_length)
    dim_loss = total_abs / float(N * CF * H) * sqrt_h
    l1_reg = total_l1 / float(H * W) / float(N * CF)               # L1Loss(mean_fp, -mean_fn)
    return dim_loss + alpha * l1_reg


def _ref_loss(predict, target, argmax_src=None, alpha=ALPHA, eps=EPS):
    """Plain-JAX mirror of the PyTorch forward (4-D case), for validation."""
    N, C, H, W = predict.shape
    if argmax_src is None:
        argmax_src = predict
    y_onehot = target
    pred_onehot = jax.nn.one_hot(jnp.argmax(argmax_src, axis=1), C, axis=1,
                                 dtype=jnp.float32)
    fp = predict * ((pred_onehot == 1) & (y_onehot == 0))
    fn = y_onehot * ((pred_onehot == 0) & (y_onehot == 1))
    dim_p = jnp.sum(fp[:, 1:], axis=-1)
    dim_t = jnp.sum(fn[:, 1:], axis=-1)
    dist_p = jnp.cumsum(dim_p, -1) / (jnp.sum(dim_p, -1, keepdims=True) + eps)
    dist_t = jnp.cumsum(dim_t, -1) / (jnp.sum(dim_t, -1, keepdims=True) + eps)
    loss = jnp.mean(jnp.abs(dist_p - dist_t)) * jnp.sqrt(jnp.float32(H))
    mean_fp = jnp.mean(fp[:, 1:].reshape(N, C - 1, -1), axis=-1)
    mean_fn = jnp.mean(fn[:, 1:].reshape(N, C - 1, -1), axis=-1)
    l1 = jnp.mean(jnp.abs(mean_fp - (-mean_fn)))
    return loss + alpha * l1


if __name__ == "__main__":
    N, C, H, W = 2, 4, 16, 16
    key = jax.random.PRNGKey(0)
    k1, k2 = jax.random.split(key)
    predict = jax.random.normal(k1, (N, C, H, W), dtype=jnp.float32)
    labels = jax.random.randint(k2, (N, H, W), 0, C)
    target = jax.nn.one_hot(labels, C, axis=1, dtype=jnp.float32)  # [N, C, H, W]

    loss = jax.block_until_ready(jax.jit(localization_loss)(predict, target))

    # Tight check: reference evaluated on the same bf16-quantized predict values
    # (argmax taken from the full-precision predict, matching the kernel path).
    predict_q = predict.astype(jnp.bfloat16).astype(jnp.float32)
    ref_exact = jax.block_until_ready(_ref_loss(predict_q, target,
                                                argmax_src=predict))
    np.testing.assert_allclose(np.asarray(loss), np.asarray(ref_exact),
                               rtol=5e-3, atol=1e-4)

    # Loose check against the full-f32 reference (bf16 input quantization budget).
    ref_f32 = jax.block_until_ready(_ref_loss(predict, target))
    np.testing.assert_allclose(np.asarray(loss), np.asarray(ref_f32),
                               rtol=2e-2, atol=2e-3)

    print("KERNEL_OK")
</pallas_src>

<mosaic_0001>
module attributes {stable_mosaic.version = 11 : i64} {
  func.func @_localization_loss_kernel(%arg0: i32, %arg1: i32, %arg2: memref<1x16x16xi32, #tpu.memory_space<vmem>>, %arg3: memref<1x3x16x16xbf16, #tpu.memory_space<vmem>>, %arg4: memref<1x3x16x16xbf16, #tpu.memory_space<vmem>>, %arg5: memref<16x16xf32, #tpu.memory_space<vmem>>, %arg6: memref<1x1x1x1xf32, #tpu.memory_space<vmem>>, %arg7: memref<1x1x1x1xf32, #tpu.memory_space<vmem>>) attributes {dimension_semantics = [#tpu.dimension_semantics<parallel>, #tpu.dimension_semantics<parallel>], iteration_bounds = array<i64: 2, 1>, scalar_prefetch = 0 : i64, scratch_operands = 0 : i64, tpu.core_type = #tpu.core_type<tc>, window_params = [{transform_indices = @transform_0, window_bounds = array<i64: 1, 16, 16>}, {transform_indices = @transform_1, window_bounds = array<i64: 1, 3, 16, 16>}, {transform_indices = @transform_2, window_bounds = array<i64: 1, 3, 16, 16>}, {pipeline_mode = #tpu.pipeline_mode<synchronous>, transform_indices = @transform_3, window_bounds = array<i64: 16, 16>}, {transform_indices = @transform_4, window_bounds = array<i64: 1, 1, 1, 1>}, {transform_indices = @transform_5, window_bounds = array<i64: 1, 1, 1, 1>}]} {
    %c0 = arith.constant 0 : index
    %c0_0 = arith.constant 0 : index
    %c0_1 = arith.constant 0 : index
    %c0_2 = arith.constant 0 : index
    %0 = vector.load %arg3[%c0, %c0_0, %c0_1, %c0_2] : memref<1x3x16x16xbf16, #tpu.memory_space<vmem>>, vector<1x3x16x16xbf16>
    %1 = vector.shape_cast %0 : vector<1x3x16x16xbf16> to vector<3x16x16xbf16>
    %2 = arith.extf %1 : vector<3x16x16xbf16> to vector<3x16x16xf32>
    %c0_3 = arith.constant 0 : index
    %c0_4 = arith.constant 0 : index
    %c0_5 = arith.constant 0 : index
    %c0_6 = arith.constant 0 : index
    %3 = vector.load %arg4[%c0_3, %c0_4, %c0_5, %c0_6] : memref<1x3x16x16xbf16, #tpu.memory_space<vmem>>, vector<1x3x16x16xbf16>
    %4 = vector.shape_cast %3 : vector<1x3x16x16xbf16> to vector<3x16x16xbf16>
    %5 = arith.extf %4 : vector<3x16x16xbf16> to vector<3x16x16xf32>
    %c0_7 = arith.constant 0 : index
    %c0_8 = arith.constant 0 : index
    %c0_9 = arith.constant 0 : index
    %6 = vector.load %arg2[%c0_7, %c0_8, %c0_9] : memref<1x16x16xi32, #tpu.memory_space<vmem>>, vector<1x16x16xi32>
    %7 = vector.shape_cast %6 : vector<1x16x16xi32> to vector<16x16xi32>
    %c3_i32 = arith.constant 3 : i32
    %8 = arith.muli %arg1, %c3_i32 : i32
    %c1_i32 = arith.constant 1 : i32
    %9 = arith.addi %c1_i32, %8 : i32
    %10 = tpu.iota {dimensions = array<i32: 0>} : vector<3x16x16xi32>
    %11 = vector.broadcast %9 : i32 to vector<3x16x16xi32>
    %12 = arith.addi %10, %11 : vector<3x16x16xi32>
    %13 = vector.shape_cast %7 : vector<16x16xi32> to vector<1x16x16xi32>
    %14 = vector.broadcast %13 : vector<1x16x16xi32> to vector<3x16x16xi32>
    %15 = arith.cmpi eq, %14, %12 : vector<3x16x16xi32>
    %cst = arith.constant 0.000000e+00 : f32
    %16 = vector.broadcast %cst : f32 to vector<3x16x16xf32>
    %17 = arith.cmpf oeq, %5, %16 : vector<3x16x16xf32>
    %18 = arith.andi %15, %17 : vector<3x16x16xi1>
    %cst_10 = arith.constant 0.000000e+00 : f32
    %19 = vector.broadcast %cst_10 : f32 to vector<3x16x16xf32>
    %20 = arith.select %18, %2, %19 : vector<3x16x16xi1>, vector<3x16x16xf32>
    %cst_11 = arith.constant dense<true> : vector<3x16x16xi1>
    %21 = arith.xori %15, %cst_11 : vector<3x16x16xi1>
    %cst_12 = arith.constant 1.000000e+00 : f32
    %22 = vector.broadcast %cst_12 : f32 to vector<3x16x16xf32>
    %23 = arith.cmpf oeq, %5, %22 : vector<3x16x16xf32>
    %24 = arith.andi %21, %23 : vector<3x16x16xi1>
    %cst_13 = arith.constant 1.000000e+00 : f32
    %cst_14 = arith.constant 0.000000e+00 : f32
    %25 = vector.broadcast %cst_13 : f32 to vector<3x16x16xf32>
    %26 = vector.broadcast %cst_14 : f32 to vector<3x16x16xf32>
    %27 = arith.select %24, %25, %26 : vector<3x16x16xi1>, vector<3x16x16xf32>
    %cst_15 = arith.constant dense<0.000000e+00> : vector<3x16xf32>
    %28 = vector.multi_reduction <add>, %20, %cst_15 [2] : vector<3x16x16xf32> to vector<3x16xf32>
    %cst_16 = arith.constant dense<0.000000e+00> : vector<3x16xf32>
    %29 = vector.multi_reduction <add>, %27, %cst_16 [2] : vector<3x16x16xf32> to vector<3x16xf32>
    %30 = tpu.concatenate %28, %29 in 0 : vector<3x16xf32>, vector<3x16xf32> -> vector<6x16xf32>
    %c0_17 = arith.constant 0 : index
    %c0_18 = arith.constant 0 : index
    %31 = vector.load %arg5[%c0_17, %c0_18] : memref<16x16xf32, #tpu.memory_space<vmem>>, vector<16x16xf32>
    %cst_19 = arith.constant dense<0.000000e+00> : vector<6x16xf32>
    %32 = tpu.matmul %30, %31, %cst_19 {dimension_numbers = #tpu.dot_dimension_numbers<[1], [0], [0], [1], [0, 0, 1, 1], [], []>} : vector<6x16xf32>, vector<16x16xf32>, vector<6x16xf32> -> vector<6x16xf32>
    %33 = vector.extract_strided_slice %32 {offsets = [0, 0], sizes = [3, 16], strides = [1, 1]} : vector<6x16xf32> to vector<3x16xf32>
    %34 = vector.extract_strided_slice %32 {offsets = [3, 0], sizes = [3, 16], strides = [1, 1]} : vector<6x16xf32> to vector<3x16xf32>
    %35 = vector.extract_strided_slice %33 {offsets = [0, 15], sizes = [3, 1], strides = [1, 1]} : vector<3x16xf32> to vector<3x1xf32>
    %36 = vector.extract_strided_slice %34 {offsets = [0, 15], sizes = [3, 1], strides = [1, 1]} : vector<3x16xf32> to vector<3x1xf32>
    %cst_20 = arith.constant 9.99999974E-6 : f32
    %37 = vector.broadcast %cst_20 : f32 to vector<3x1xf32>
    %38 = arith.addf %35, %37 : vector<3x1xf32>
    %39 = vector.broadcast %38 : vector<3x1xf32> to vector<3x16xf32>
    %40 = arith.divf %33, %39 : vector<3x16xf32>
    %cst_21 = arith.constant 9.99999974E-6 : f32
    %41 = vector.broadcast %cst_21 : f32 to vector<3x1xf32>
    %42 = arith.addf %36, %41 : vector<3x1xf32>
    %43 = vector.broadcast %42 : vector<3x1xf32> to vector<3x16xf32>
    %44 = arith.divf %34, %43 : vector<3x16xf32>
    %45 = arith.subf %40, %44 : vector<3x16xf32>
    %46 = math.absf %45 : vector<3x16xf32>
    %47 = vector.shape_cast %46 : vector<3x16xf32> to vector<1x3x16xf32>
    %cst_22 = arith.constant dense<0.000000e+00> : vector<1xf32>
    %48 = vector.multi_reduction <add>, %47, %cst_22 [1, 2] : vector<1x3x16xf32> to vector<1xf32>
    %49 = vector.shape_cast %48 : vector<1xf32> to vector<1x1x1xf32>
    %50 = vector.extract %49[0, 0, 0] : f32 from vector<1x1x1xf32>
    %51 = vector.broadcast %50 : f32 to vector<1x1x1x1xf32>
    %c0_23 = arith.constant 0 : index
    %c0_24 = arith.constant 0 : index
    %c0_25 = arith.constant 0 : index
    %c0_26 = arith.constant 0 : index
    %52 = vector.load %arg6[%c0_23, %c0_24, %c0_25, %c0_26] : memref<1x1x1x1xf32, #tpu.memory_space<vmem>>, vector<1x1x1x1xf32>
    tpu.vector_store %arg6[%c0_23, %c0_24, %c0_25, %c0_26], %51 {strides = array<i32>} : memref<1x1x1x1xf32, #tpu.memory_space<vmem>>, vector<1x1x1x1xf32>,
    %53 = arith.addf %35, %36 : vector<3x1xf32>
    %54 = math.absf %53 : vector<3x1xf32>
    %55 = vector.shape_cast %54 : vector<3x1xf32> to vector<1x3x1xf32>
    %cst_27 = arith.constant dense<0.000000e+00> : vector<1xf32>
    %56 = vector.multi_reduction <add>, %55, %cst_27 [1, 2] : vector<1x3x1xf32> to vector<1xf32>
    %57 = vector.shape_cast %56 : vector<1xf32> to vector<1x1x1xf32>
    %58 = vector.extract %57[0, 0, 0] : f32 from vector<1x1x1xf32>
    %59 = vector.broadcast %58 : f32 to vector<1x1x1x1xf32>
    %c0_28 = arith.constant 0 : index
    %c0_29 = arith.constant 0 : index
    %c0_30 = arith.constant 0 : index
    %c0_31 = arith.constant 0 : index
    %60 = vector.load %arg7[%c0_28, %c0_29, %c0_30, %c0_31] : memref<1x1x1x1xf32, #tpu.memory_space<vmem>>, vector<1x1x1x1xf32>
    tpu.vector_store %arg7[%c0_28, %c0_29, %c0_30, %c0_31], %59 {strides = array<i32>} : memref<1x1x1x1xf32, #tpu.memory_space<vmem>>, vector<1x1x1x1xf32>,
    return
  }
  func.func @transform_0(%arg0: i32, %arg1: i32) -> (i32, i32, i32) {
    %c0_i32 = arith.constant 0 : i32
    %c0_i32_0 = arith.constant 0 : i32
    %c0_i32_1 = arith.constant 0 : i32
    return %arg0, %c0_i32, %c0_i32_0 : i32, i32, i32
  }
  func.func @transform_1(%arg0: i32, %arg1: i32) -> (i32, i32, i32, i32) {
    %c0_i32 = arith.constant 0 : i32
    %c0_i32_0 = arith.constant 0 : i32
    %c0_i32_1 = arith.constant 0 : i32
    return %arg0, %arg1, %c0_i32, %c0_i32_0 : i32, i32, i32, i32
  }
  func.func @transform_2(%arg0: i32, %arg1: i32) -> (i32, i32, i32, i32) {
    %c0_i32 = arith.constant 0 : i32
    %c0_i32_0 = arith.constant 0 : i32
    %c0_i32_1 = arith.constant 0 : i32
    return %arg0, %arg1, %c0_i32, %c0_i32_0 : i32, i32, i32, i32
  }
  func.func @transform_3(%arg0: i32, %arg1: i32) -> (i32, i32) {
    %c0_i32 = arith.constant 0 : i32
    %c0_i32_0 = arith.constant 0 : i32
    %c0_i32_1 = arith.constant 0 : i32
    return %c0_i32, %c0_i32_0 : i32, i32
  }
  func.func @transform_4(%arg0: i32, %arg1: i32) -> (i32, i32, i32, i32) {
    %c0_i32 = arith.constant 0 : i32
    %c0_i32_0 = arith.constant 0 : i32
    %c0_i32_1 = arith.constant 0 : i32
    return %arg0, %arg1, %c0_i32, %c0_i32_0 : i32, i32, i32, i32
  }
  func.func @transform_5(%arg0: i32, %arg1: i32) -> (i32, i32, i32, i32) {
    %c0_i32 = arith.constant 0 : i32
    %c0_i32_0 = arith.constant 0 : i32
    %c0_i32_1 = arith.constant 0 : i32
    return %arg0, %arg1, %c0_i32, %c0_i32_0 : i32, i32, i32, i32
  }
}

</mosaic_0001>

<bundles_post_ra>
// kernel: localization_loss.1
= control target key start
LH: loop header
LB: loop body
LE: loop exit
PB: predicated region body
PF: predicated region fallthrough
CT: control target
= control target key end

     0   :  { %s952_s18 = smov 0   ;;  %s954_s19 = smov 0   ;;  %s1118_s0 = inlined_call_operand.vmem [shape: s32[2,16,16], index: 0, kind: input, shape index: {}]   ;;  %s1119_s1 = inlined_call_operand.vmem [shape: bf16[2,3,16,16], index: 1, kind: input, shape index: {}]   ;;  %s1120_s2 = inlined_call_operand.vmem [shape: bf16[2,3,16,16], index: 2, kind: input, shape index: {}]   ;;  %s1121_s3 = inlined_call_operand.vmem [shape: f32[16,16], index: 3, kind: input, shape index: {}]   ;;  %s1122_s4 = inlined_call_operand.vmem [shape: f32[2,1,1,1], index: 4, kind: output, shape index: {0}]   ;;  %s1123_s5 = inlined_call_operand.vmem [shape: f32[2,1,1,1], index: 5, kind: output, shape index: {1}]  }
   0x1   :  { %s956_s20 = smov 0  }
   0x2 LB: > { %s28_s21 = sadd.s32 1, %s910_s19  ;;  %p804_p0 = scmp.ge.s32.totalorder %s914_s20, 1  ;;  %s914_s20 = sphi %s956_s20, %s16_s20   ;;  %s910_s19 = sphi %s954_s19, %s1144_s19   ;;  %s906_s18 = sphi %s952_s18, %s1143_s18  }
   0x3   : > { %p30_p1 = scmp.ge.s32.totalorder %s28_s21, 2  ;;  %p242_p2 = scmp.lt.s32.totalorder %s914_s20, 3 }
   0x5   : > { %s1146_s21 = smov (%p30_p1, %s28_s21), 0  ;;  %p243_p3 = pnand %p804_p0, %p242_p2 }
   0x6   : > { %p297_p4 = scmp.lt.s32.totalorder (!%p243_p3), %s906_s18, 1  ;;  %vm1124_vm3 = vmmov (!%p243_p3), 1   ;;  %vm415_vm7 = vcmask (!%p243_p3), 130048   ;;  %v917_v32 = vmov (!%p243_p3), 0.0   ;;  %v534_v53 = vld [vmem:[%s1121_s3] sm:$0xff] (!%p243_p3)  ;;  %v535_v54 = vld [vmem:[%s1121_s3 + $0x8] sm:$0xff] (!%p243_p3)  ;;  %v458_v59 = vlaneseq (!%p243_p3) }
   0x7   : > { %246 = sbr.rel (%p243_p3) target bundleno = 763 (0x2fb), region = 36  ;;  %v852_v55 = vpack.c.bf16 (!%p243_p3), %v535_v54, %v534_v53  ;;  %v918_v56 = vmov (!%p243_p3), 0.0|0.0   ;;  %s921_s12 = smov (!%p243_p3), 113  }
   0x8   : > { %851 = vmatprep.subr.bf16.mxu0 (!%p243_p3), %v918_v56  ;;  %v459_v62 = vand.u32 (!%p243_p3), 127, %v458_v59 }
   0x9   : > { %853 = vmatpush3.bf16.msra.mxu0 (!%p243_p3), %v852_v55 }
   0xe   : > { %s1148_s18 = smov (!%p297_p4, %s906_s18), 1 }
   0xf   : > { %s812_s22 = sshll.u32 %s1148_s18, 4  ;;  %s854_s23 = smul.u32 24, %s1148_s18 }
  0x10   : > { %s301_s26 = scalar_lea.vmem %s1118_s0, %s812_s22  ;;  %s329_s15 = scalar_lea.vmem %s1122_s4, %s1148_s18 }
  0x11   : > { %s980_s29 = scalar_lea.vmem %s1119_s1, %s854_s23  ;;  %s322_s7 = scalar_lea.vmem %s1120_s2, %s854_s23  ;;  %v985_v0 = vld [vmem:[%s301_s26] sm:$0xff]  ;;  %v987_v1 = vld [vmem:[%s301_s26 + $0x8] sm:$0xff] }
  0x12   : > { %v837_v2 = vld [vmem:[%s980_s29 + $0x8] sm:$0xff]   ;;  %v814_v4 = vld [vmem:[%s980_s29] sm:$0xff]   ;;  %vm367_vm0 = vcmp.eq.s32.totalorder %v985_v0, 1  ;;  %vm369_vm1 = vcmp.eq.s32.totalorder %v985_v0, 2  ;;  %vm370_vm2 = vcmp.eq.s32.totalorder %v987_v1, 2  ;;  %v840_v17 = vld [vmem:[%s322_s7 + $0x10] sm:$0xff]   ;;  %s335_s23 = scalar_lea.vmem %s1123_s5, %s1148_s18 }
  0x13   : > { %v839_v3 = vld [vmem:[%s322_s7 + $0x8] sm:$0xff]   ;;  %v819_v5 = vunpack.c.l.bf16 %v837_v2  ;;  %v826_v7 = vld [vmem:[%s322_s7] sm:$0xff]   ;;  %vm997_vm4 = vmxor %vm367_vm0, %vm1124_vm3  ;;  %v815_v9 = vunpack.c.l.bf16 %v814_v4  ;;  %v820_v14 = vunpack.c.h.bf16 %v837_v2  ;;  %v816_v15 = vunpack.c.h.bf16 %v814_v4 }
  0x14   : > { %v831_v6 = vunpack.c.l.bf16 %v839_v3  ;;  %v827_v10 = vunpack.c.l.bf16 %v826_v7  ;;  %v832_v11 = vunpack.c.h.bf16 %v839_v3  ;;  %v828_v12 = vunpack.c.h.bf16 %v826_v7  ;;  %vm1004_vm5 = vmxor %vm370_vm2, %vm1124_vm3  ;;  %v838_v34 = vld [vmem:[%s980_s29 + $0x10] sm:$0xff]  }
  0x15   : > { %vm1011_vm8 = vmxor %vm369_vm1, %vm1124_vm3  ;;  %vm368_vm12 = vcmp.eq.s32.totalorder %v987_v1, 1  ;;  %v836_v22 = vunpack.c.h.bf16 %v840_v17  ;;  %v835_v26 = vunpack.c.l.bf16 %v840_v17  ;;  %v824_v39 = vunpack.c.h.bf16 %v838_v34 }
  0x16   : > { %vm375_vm6 = vcmp.eq.f32.partialorder %v831_v6, 0.0  ;;  %vm373_vm10 = vcmp.eq.f32.partialorder %v827_v10, 0.0  ;;  %vm376_vm11 = vcmp.eq.f32.partialorder %v832_v11, 0.0  ;;  %vm374_vm13 = vcmp.eq.f32.partialorder %v828_v12, 0.0 }
  0x17   : > { %vm381_vm9 = vmand %vm369_vm1, %vm375_vm6  ;;  %vm1023_vm3 = vcmp.eq.f32.partialorder %v828_v12, 1.0  ;;  %v823_v41 = vunpack.c.l.bf16 %v838_v34  ;;  %v461_v2 = vshrl.u32 %v458_v59, 7  ;;  %v920_v34 = vmov 15  }
  0x18   : > { %v387_v18 = vsel %vm381_vm9, %v819_v5, 0.0  ;;  %vm379_vm14 = vmand %vm367_vm0, %vm373_vm10  ;;  %vm1030_vm0 = vcmp.eq.f32.partialorder %v827_v10, 1.0  ;;  %vm1038_vm9 = vcmp.eq.f32.partialorder %v832_v11, 1.0  ;;  %889 = vset.pattern.permute.xlu0 %v920_v34 }
  0x19   : > { %v422_v19 = vsel %vm415_vm7, %v387_v18, 0.0  ;;  %v385_v20 = vsel %vm379_vm14, %v815_v9, 0.0  ;;  %vm382_vm15 = vmand %vm370_vm2, %vm376_vm11  ;;  %vm1136_vm2 = vmmov 1   ;;  %vm1045_vm11 = vcmp.eq.f32.partialorder %v831_v6, 1.0 }
  0x1a   : > { %423 = vadd.xlane.f32.xlu1 %v422_v19  ;;  %v416_v23 = vsel %vm415_vm7, %v385_v20, 0.0  ;;  %v388_v24 = vsel %vm382_vm15, %v820_v14, 0.0  ;;  %vm380_vm1 = vmand %vm368_vm12, %vm374_vm13  ;;  %vm372_vm13 = vcmp.eq.s32.totalorder %v987_v1, 3  ;;  %vm378_vm14 = vcmp.eq.f32.partialorder %v836_v22, 0.0 }
  0x1b   : > { %417 = vadd.xlane.f32.xlu0 %v416_v23  ;;  %v425_v27 = vsel %vm415_vm7, %v388_v24, 0.0  ;;  %v386_v28 = vsel %vm380_vm1, %v816_v15, 0.0  ;;  %vm392_vm6 = vmxor %vm368_vm12, %vm1136_vm2  ;;  %vm371_vm15 = vcmp.eq.s32.totalorder %v985_v0, 3  ;;  %vm377_vm1 = vcmp.eq.f32.partialorder %v835_v26, 0.0 }
  0x1c   : > { %v419_v30 = vsel %vm415_vm7, %v386_v28, 0.0  ;;  %vm404_vm10 = vmand %vm392_vm6, %vm1023_vm3  ;;  %v464_v0 = vadd.s32 4294967288, %v459_v62  ;;  %v462_v6 = vsub.s32 %v459_v62, %v461_v2 }
  0x1d   : > { %v410_v33 = vsel %vm404_vm10, 1.0, %v917_v32  ;;  %vm403_vm12 = vmand %vm997_vm4, %vm1030_vm0 }
  0x1e   : > { %426 = vadd.xlane.f32.xlu1 %v425_v27  ;;  %v409_v35 = vsel %vm403_vm12, 1.0, %v917_v32  ;;  %vm406_vm3 = vmand %vm1004_vm5, %vm1038_vm9  ;;  %v437_v36 = vsel %vm415_vm7, %v410_v33, 0.0  ;;  %vm401_vm9 = vcmp.eq.f32.partialorder %v835_v26, 1.0  ;;  %v467_v4 = vsub.s32 %v464_v0, %v461_v2 }
  0x1f   : > { %420 = vadd.xlane.f32.xlu0 %v419_v30  ;;  %vm405_vm4 = vmand %vm1011_vm8, %vm1045_vm11  ;;  %v434_v37 = vsel %vm415_vm7, %v409_v35, 0.0  ;;  %v412_v38 = vsel %vm406_vm3, 1.0, %v917_v32  ;;  %vm402_vm8 = vcmp.eq.f32.partialorder %v836_v22, 1.0  ;;  %vm527_vm3 = vcmask 1044484  }
  0x20   : > { %vm384_vm0 = vmand %vm372_vm13, %vm378_vm14  ;;  %v411_v40 = vsel %vm405_vm4, 1.0, %v917_v32  ;;  %v443_v43 = vsel %vm415_vm7, %v412_v38, 0.0  ;;  %vm489_vm14 = vcmask 1041409   ;;  %vm532_vm4 = vcmask 1042432  }
  0x21   : > { %vm383_vm5 = vmand %vm371_vm15, %vm377_vm1  ;;  %v440_v44 = vsel %vm415_vm7, %v411_v40, 0.0  ;;  %v390_v45 = vsel %vm384_vm0, %v824_v39, 0.0  ;;  %vm529_vm1 = vcmask 1045509   ;;  %vm645_vm0 = vcmask 2048  }
  0x22   : > { %438 = vadd.xlane.f32.xlu1 %v437_v36  ;;  %vm1073_vm6 = vmxor %vm372_vm13, %vm1136_vm2  ;;  %v389_v46 = vsel %vm383_vm5, %v823_v41, 0.0  ;;  %v431_v47 = vsel %vm415_vm7, %v390_v45, 0.0  ;;  %vm469_vm13 = vcmask 130112   ;;  %vm634_vm5 = vcmask 0  }
  0x23   : > { %435 = vadd.xlane.f32.xlu0 %v434_v37  ;;  %vm395_vm10 = vmxor %vm371_vm15, %vm1136_vm2  ;;  %v428_v48 = vsel %vm415_vm7, %v389_v46, 0.0  ;;  %vm919_vm2 = vmmov 0   ;;  %vm491_vm15 = vcmask 1042434  }
  0x24   : > { %vm408_vm11 = vmand %vm1073_vm6, %vm402_vm8  ;;  %848 = vmatprep.mubr.msk.f32.mxu0 %vm919_vm2, %v917_v32 }
  0x25   : > { %vm407_vm12 = vmand %vm395_vm10, %vm401_vm9  ;;  %v414_v49 = vsel %vm408_vm11, 1.0, %v917_v32 }
  0x26   : > { %444 = vadd.xlane.f32.xlu1 %v443_v43  ;;  %v413_v50 = vsel %vm407_vm12, 1.0, %v917_v32  ;;  %v449_v51 = vsel %vm415_vm7, %v414_v49, 0.0 }
  0x27   : > { %441 = vadd.xlane.f32.xlu0 %v440_v44  ;;  %v446_v52 = vsel %vm415_vm7, %v413_v50, 0.0 }
  0x2a   : > { %432 = vadd.xlane.f32.xlu1 %v431_v47 }
  0x2b   : > { %429 = vadd.xlane.f32.xlu0 %v428_v48 }
  0x2e   : > { %450 = vadd.xlane.f32.xlu1 %v449_v51 }
  0x2f   : > { %447 = vadd.xlane.f32.xlu0 %v446_v52 }
  0xa7   : > { %v424_v57 = vpop.xlane.xlu1 %423 }
  0xa8   : > { %v418_v58 = vpop.xlane.xlu0 %417  ;;  %v474_v15 = vrot.slane %v424_v57, %v462_v6 }
  0xa9   : > { %v463_v16 = vrot.slane %v418_v58, %v462_v6 }
  0xab   : > { %v427_v60 = vpop.xlane.xlu1 %426 }
  0xac   : > { %v421_v61 = vpop.xlane.xlu0 %420  ;;  %v478_v8 = vrot.slane %v427_v60, %v467_v4 }
  0xad   : > { %v468_v9 = vrot.slane %v421_v61, %v467_v4 }
  0xae   : > { %v479_v20 = vsel %vm469_vm13, %v478_v8, %v474_v15 }
  0xaf   : > { %v439_v63 = vpop.xlane.xlu1 %438  ;;  %v470_v21 = vsel %vm469_vm13, %v468_v9, %v463_v16 }
  0xb0   : > { %v436_v1 = vpop.xlane.xlu0 %435  ;;  %v507_v17 = vrot.slane %v439_v63, %v467_v4  ;;  %v490_v28 = vsel %vm489_vm14, %v479_v20, %v470_v21 }
  0xb1   : > { %v503_v18 = vrot.slane %v436_v1, %v462_v6 }
  0xb3   : > { %v445_v3 = vpop.xlane.xlu1 %444  ;;  %v508_v27 = vsel %vm469_vm13, %v507_v17, %v503_v18 }
  0xb4   : > { %v442_v5 = vpop.xlane.xlu0 %441  ;;  %v516_v10 = vrot.slane %v445_v3, %v467_v4 }
  0xb5   : > { %v512_v11 = vrot.slane %v442_v5, %v462_v6 }
  0xb7   : > { %v433_v7 = vpop.xlane.xlu1 %432  ;;  %v517_v22 = vsel %vm469_vm13, %v516_v10, %v512_v11 }
  0xb8   : > { %v430_v12 = vpop.xlane.xlu0 %429  ;;  %v487_v13 = vrot.slane %v433_v7, %v467_v4  ;;  %v528_v29 = vsel %vm527_vm3, %v517_v22, %v508_v27 }
  0xb9   : > { %v483_v14 = vrot.slane %v430_v12, %v462_v6 }
  0xbb   : > { %v451_v19 = vpop.xlane.xlu1 %450  ;;  %v488_v25 = vsel %vm469_vm13, %v487_v13, %v483_v14 }
  0xbc   : > { %v525_v23 = vrot.slane %v451_v19, %v467_v4  ;;  %v448_v24 = vpop.xlane.xlu0 %447  ;;  %v492_v31 = vsel %vm491_vm15, %v488_v25, %v490_v28 }
  0xbd   : > { %v521_v26 = vrot.slane %v448_v24, %v462_v6 }
  0xbf   : > { %v526_v30 = vsel %vm469_vm13, %v525_v23, %v521_v26 }
  0xc0   : > { %v530_v32 = vsel %vm529_vm1, %v526_v30, %v528_v29 }
  0xc1   : > { %v533_v33 = vsel %vm532_vm4, %v492_v31, %v530_v32 }
  0xc2   : > { %849 = vmatmul.mubr.msk.f32.vlgmr.msra.gmra.mrb[0].mxu0 %vm415_vm7, %v533_v33  ;;  %vm622_vm7 = vcmask 124928  }
 0x195   : > { %v605_v35 = vpop.f32.mrb[0].mxu0 }
 0x196   : > { %v637_v36 = vrot.slane %v605_v35, 3  ;;  %v850_v37 = vpop.f32.mrb[1].mxu0  ;;  %v609_v38 = vadd.f32 1e-05, %v605_v35 }
 0x198   : > { %612 = vperm.xlu0 %889, %v609_v38   ;;  %v639_v39 = vadd.f32 %v637_v36, %v605_v35 }
 0x19a   : > { %v640_v40 = vand.u32 2147483647, %v639_v39 }
 0x19c   : > { %642 = vrot.lane.b32.xlu1 %v640_v40, %s921_s12 }
 0x20e   : > { %v643_v41 = vpop.permute.xlu1 %642 }
 0x20f   : > { %v646_v42 = vsel %vm645_vm0, %v643_v41, 0.0 }
 0x210   : > { %647 = vadd.xlane.f32.xlu0 %v646_v42 }
 0x217   : > { %v613_v43 = vpop.permute.xlu0 %612 }
 0x218   : > { %890 = vrcp.f32 %v613_v43 }
 0x222   : > { %v891_v44 = vpop.eup %890 }
 0x223   : > { %v616_v45 = vmul.f32 %v891_v44, %v605_v35 }
 0x225   : > { %v618_v46 = vrot.slane %v616_v45, 3 }
 0x227   : > { %v620_v47 = vsub.f32 %v616_v45, %v618_v46 }
 0x229   : > { %v621_v48 = vand.u32 2147483647, %v620_v47 }
 0x22b   : > { %v623_v49 = vsel %vm622_vm7, %v621_v48, 0.0 }
 0x22c   : > { %624 = vadd.xlane.f32.xlu1 %v623_v49 }
 0x29d   : > { %v648_v50 = vpop.xlane.xlu0 %647 }
 0x29e   : > { %v649_v51 = vrot.slane %v648_v50, 4 }
 0x2a0   : > { %v650_v52 = vadd.f32 %v649_v51, %v648_v50 }
 0x2a2   : > { %v651_v53 = vrot.slane %v650_v52, 2 }
 0x2a4   : > { %v652_v57 = vadd.f32 %v651_v53, %v650_v52 }
 0x2a6   : > { %v653_v60 = vrot.slane %v652_v57, 1 }
 0x2a8   : > { %v654_v63 = vadd.f32 %v653_v60, %v652_v57 }
 0x2b9   : > { %v625_v54 = vpop.xlane.xlu1 %624 }
 0x2ba   : > { %v626_v55 = vrot.slane %v625_v54, 4 }
 0x2bc   : > { %v627_v56 = vadd.f32 %v626_v55, %v625_v54 }
 0x2be   : > { %v628_v58 = vrot.slane %v627_v56, 2 }
 0x2c0   : > { %v629_v59 = vadd.f32 %v628_v58, %v627_v56 }
 0x2c2   : > { %v630_v61 = vrot.slane %v629_v59, 1 }
 0x2c4   : > { %v631_v62 = vadd.f32 %v630_v61, %v629_v59 }
 0x2c6   : > { %855 = vpush %v631_v62 }
 0x2c7   : > { %857 = vpush %v654_v63 }
 0x2f7   : > { %s856_s16 = spop %855 }
 0x2f8   : > { %v633_v0 = vstv %s856_s16  ;;  %s858_s24 = spop %857 }
 0x2f9   : > { %635 = vst.msk [vmem:[%s329_s15] sm:$0x1] %vm634_vm5, %v633_v0  ;;  %v656_v1 = vstv %s858_s24 }
 0x2fa   : > { %657 = vst.msk [vmem:[%s335_s23] sm:$0x1] %vm634_vm5, %v656_v1 }
 0x2fb PF: > { %s16_s20 = sadd.s32 1, %s914_s20   ;;  %s1143_s18 = smov %s910_s19 }
 0x2fc   : > { %p13_p5 = scmp.ge.s32.totalorder %s16_s20, 4   ;;  %s1144_s19 = smov %s1146_s21 }
 0x2fe   :  { %15 = sbr.rel (!%p13_p5) target bundleno = 2 (0x2), region = 84 }

</bundles_post_ra>
